<compile_context>
chip_gen: v6e
topology: v6e:2x2x1
jax: 0.10.0
libtpu: 0.0.40
codegen_flags: <defaults>
</compile_context>

<pallas_src>
import math
import functools

import jax
import jax.numpy as jnp
from jax.experimental import pallas as pl
from jax.experimental.pallas import tpu as pltpu

# MXU operand dtype (f32 accumulation is kept via preferred_element_type / f32 scratch).
DOT_DTYPE = jnp.bfloat16
# Scoped-VMEM cap handed to Mosaic; actual usage is tile-bounded well below this.
VMEM_LIMIT = 64 * 1024 * 1024


# ------------------------------ tiling helpers ------------------------------

def _tile_for(dim, target, mult=128):
    """Return (tile, padded_dim): `tile` divides `padded_dim`, is <= target and a
    multiple of `mult` (or the full dim when dim <= target).  Pads instead of
    falling back to a huge full-dim block (fixes the old _tile trap)."""
    if dim <= target:
        return dim, dim
    t = max((target // mult) * mult, mult)
    tt = t
    while tt >= mult:
        if dim % tt == 0:
            return tt, dim
        tt -= mult
    padded = ((dim + t - 1) // t) * t
    return t, padded


def _seq_tile(T, target):
    """Sequence tile that divides T exactly (attention is not padded)."""
    if T <= target:
        return T
    t = (target // 128) * 128
    while t >= 128:
        if T % t == 0:
            return t
        t -= 128
    t = (target // 8) * 8
    while t >= 8:
        if T % t == 0:
            return t
        t -= 8
    return T  # TODO(synk): pad ragged sequence lengths instead of a full-T block


def _pad_dim(a, axis, new):
    if a.shape[axis] == new:
        return a
    pads = [(0, 0)] * a.ndim
    pads[axis] = (0, new - a.shape[axis])
    return jnp.pad(a, pads)


# ----------------------------- GEMM kernels -----------------------------

def _linear_kernel(x_ref, w_ref, b_ref, o_ref, acc_ref):
    k = pl.program_id(2)

    @pl.when(k == 0)
    def _():
        acc_ref[...] = jnp.zeros_like(acc_ref)

    acc_ref[...] += jnp.dot(x_ref[...].astype(DOT_DTYPE),
                            w_ref[...].astype(DOT_DTYPE),
                            preferred_element_type=jnp.float32)

    @pl.when(k == pl.num_programs(2) - 1)
    def _():
        o_ref[...] = (acc_ref[...] + b_ref[...]).astype(o_ref.dtype)


def pallas_linear(x, w, b, *, tm=256, tn=512, tk=512):
    # x: (M, K), w: (K, N), b: (1, N) -> (M, N)
    M, K = x.shape
    N = w.shape[1]
    tm, Mp = _tile_for(M, tm)
    tn, Np = _tile_for(N, tn)
    tk, Kp = _tile_for(K, tk)
    x = _pad_dim(_pad_dim(x, 0, Mp), 1, Kp)
    w = _pad_dim(_pad_dim(w, 0, Kp), 1, Np)
    b = _pad_dim(b, 1, Np)
    out = pl.pallas_call(
        _linear_kernel,
        out_shape=jax.ShapeDtypeStruct((Mp, Np), x.dtype),
        grid=(Mp // tm, Np // tn, Kp // tk),
        in_specs=[
            pl.BlockSpec((tm, tk), lambda i, j, k: (i, k)),
            pl.BlockSpec((tk, tn), lambda i, j, k: (k, j)),
            pl.BlockSpec((1, tn), lambda i, j, k: (0, j)),
        ],
        out_specs=pl.BlockSpec((tm, tn), lambda i, j, k: (i, j)),
        scratch_shapes=[pltpu.VMEM((tm, tn), jnp.float32)],
        compiler_params=pltpu.CompilerParams(
            dimension_semantics=("parallel", "parallel", "arbitrary"),
            vmem_limit_bytes=VMEM_LIMIT),
    )(x, w, b)
    if Mp != M or Np != N:
        out = out[:M, :N]
    return out


def _linear_res_ln_kernel(x_ref, w_ref, b_ref, r_ref, g_ref, be_ref, o_ref, acc_ref):
    # LN(res + x @ w + b), LN fused into the K-loop finalize (full-width out tile).
    k = pl.program_id(1)

    @pl.when(k == 0)
    def _():
        acc_ref[...] = jnp.zeros_like(acc_ref)

    acc_ref[...] += jnp.dot(x_ref[...].astype(DOT_DTYPE),
                            w_ref[...].astype(DOT_DTYPE),
                            preferred_element_type=jnp.float32)

    @pl.when(k == pl.num_programs(1) - 1)
    def _():
        y = acc_ref[...] + b_ref[...] + r_ref[...]
        mu = jnp.mean(y, axis=-1, keepdims=True)
        var = jnp.mean(jnp.square(y - mu), axis=-1, keepdims=True)
        yn = (y - mu) * jax.lax.rsqrt(var + 1e-5)
        o_ref[...] = (yn * g_ref[...] + be_ref[...]).astype(o_ref.dtype)


def pallas_linear_res_ln(x, w, b, res, gamma, beta, *, tm=256, tk=512):
    # x: (M, K), w: (K, N=H), res: (M, N) -> LN(res + x@w + b): (M, N)
    M, K = x.shape
    N = w.shape[1]
    tk_cap = max(128, ((4 << 20) // (4 * N)) // 128 * 128)   # keep weight tile modest
    tm, Mp = _tile_for(M, tm)
    tk, Kp = _tile_for(K, min(tk, tk_cap))
    x = _pad_dim(_pad_dim(x, 0, Mp), 1, Kp)
    w = _pad_dim(w, 0, Kp)
    res = _pad_dim(res, 0, Mp)
    out = pl.pallas_call(
        _linear_res_ln_kernel,
        out_shape=jax.ShapeDtypeStruct((Mp, N), x.dtype),
        grid=(Mp // tm, Kp // tk),
        in_specs=[
            pl.BlockSpec((tm, tk), lambda i, k: (i, k)),
            pl.BlockSpec((tk, N), lambda i, k: (k, 0)),
            pl.BlockSpec((1, N), lambda i, k: (0, 0)),
            pl.BlockSpec((tm, N), lambda i, k: (i, 0)),
            pl.BlockSpec((1, N), lambda i, k: (0, 0)),
            pl.BlockSpec((1, N), lambda i, k: (0, 0)),
        ],
        out_specs=pl.BlockSpec((tm, N), lambda i, k: (i, 0)),
        scratch_shapes=[pltpu.VMEM((tm, N), jnp.float32)],
        compiler_params=pltpu.CompilerParams(
            dimension_semantics=("parallel", "arbitrary"),
            vmem_limit_bytes=VMEM_LIMIT),
    )(x, w, b, res, gamma, beta)
    if Mp != M:
        out = out[:M]
    return out


def _ffn_res_ln_kernel(x_ref, w1_ref, b1_ref, w2_ref, b2_ref, g_ref, be_ref,
                       o_ref, acc_ref):
    # LN(x + relu(x@w1 + b1) @ w2 + b2), F axis tiled; residual = x tile itself.
    f = pl.program_id(1)

    @pl.when(f == 0)
    def _():
        acc_ref[...] = jnp.zeros_like(acc_ref)

    h = jnp.dot(x_ref[...].astype(DOT_DTYPE), w1_ref[...].astype(DOT_DTYPE),
                preferred_element_type=jnp.float32) + b1_ref[...]
    h = jnp.maximum(h, 0.0)                       # ReLU (PyTorch default activation)
    acc_ref[...] += jnp.dot(h.astype(DOT_DTYPE), w2_ref[...].astype(DOT_DTYPE),
                            preferred_element_type=jnp.float32)

    @pl.when(f == pl.num_programs(1) - 1)
    def _():
        y = x_ref[...] + acc_ref[...] + b2_ref[...]
        mu = jnp.mean(y, axis=-1, keepdims=True)
        var = jnp.mean(jnp.square(y - mu), axis=-1, keepdims=True)
        yn = (y - mu) * jax.lax.rsqrt(var + 1e-5)
        o_ref[...] = (yn * g_ref[...] + be_ref[...]).astype(o_ref.dtype)


def pallas_ffn_res_ln(x, w1, b1, w2, b2, gamma, beta, *, tm=256, tf=512):
    M, H = x.shape
    F = w1.shape[1]
    # VMEM-aware F tile (v7x 64 MiB): cap each (H, tf)/(tf, H) weight tile ~4 MiB.
    tf_cap = max(128, ((4 << 20) // (4 * H)) // 128 * 128)
    tm, Mp = _tile_for(M, tm)
    tf, Fp = _tile_for(F, min(tf, tf_cap))
    x = _pad_dim(x, 0, Mp)
    w1 = _pad_dim(w1, 1, Fp)
    b1 = _pad_dim(b1, 1, Fp)
    w2 = _pad_dim(w2, 0, Fp)
    out = pl.pallas_call(
        _ffn_res_ln_kernel,
        out_shape=jax.ShapeDtypeStruct((Mp, H), x.dtype),
        grid=(Mp // tm, Fp // tf),
        in_specs=[
            pl.BlockSpec((tm, H), lambda i, f: (i, 0)),
            pl.BlockSpec((H, tf), lambda i, f: (0, f)),
            pl.BlockSpec((1, tf), lambda i, f: (0, f)),
            pl.BlockSpec((tf, H), lambda i, f: (f, 0)),
            pl.BlockSpec((1, H), lambda i, f: (0, 0)),
            pl.BlockSpec((1, H), lambda i, f: (0, 0)),
            pl.BlockSpec((1, H), lambda i, f: (0, 0)),
        ],
        out_specs=pl.BlockSpec((tm, H), lambda i, f: (i, 0)),
        scratch_shapes=[pltpu.VMEM((tm, H), jnp.float32)],
        compiler_params=pltpu.CompilerParams(
            dimension_semantics=("parallel", "arbitrary"),
            vmem_limit_bytes=VMEM_LIMIT),
    )(x, w1, b1, w2, b2, gamma, beta)
    if Mp != M:
        out = out[:M]
    return out


def _logits_kernel(x_ref, e_ref, o_ref, acc_ref, *, scale):
    k = pl.program_id(2)

    @pl.when(k == 0)
    def _():
        acc_ref[...] = jnp.zeros_like(acc_ref)

    # x @ emb^T without materializing the transpose in HBM (contraction on both
    # operands' last dim); 1/temperature folded into the finalize.
    acc_ref[...] += jax.lax.dot_general(
        x_ref[...].astype(DOT_DTYPE), e_ref[...].astype(DOT_DTYPE),
        (((1,), (1,)), ((), ())), preferred_element_type=jnp.float32)

    @pl.when(k == pl.num_programs(2) - 1)
    def _():
        o_ref[...] = (acc_ref[...] * scale).astype(o_ref.dtype)


def pallas_logits(x, emb, scale, *, tm=512, tn=512, tk=512):
    # x: (M, H), emb: (V, H) -> (M, V); vocab padded to a 128-multiple tile.
    M, H = x.shape
    V = emb.shape[0]
    tm, Mp = _tile_for(M, tm)
    tn, Vp = _tile_for(V, tn)
    tk, Kp = _tile_for(H, tk)
    x = _pad_dim(_pad_dim(x, 0, Mp), 1, Kp)
    emb = _pad_dim(_pad_dim(emb, 0, Vp), 1, Kp)
    out = pl.pallas_call(
        functools.partial(_logits_kernel, scale=scale),
        out_shape=jax.ShapeDtypeStruct((Mp, Vp), x.dtype),
        grid=(Mp // tm, Vp // tn, Kp // tk),
        in_specs=[
            pl.BlockSpec((tm, tk), lambda i, j, k: (i, k)),
            pl.BlockSpec((tn, tk), lambda i, j, k: (j, k)),
        ],
        out_specs=pl.BlockSpec((tm, tn), lambda i, j, k: (i, j)),
        scratch_shapes=[pltpu.VMEM((tm, tn), jnp.float32)],
        compiler_params=pltpu.CompilerParams(
            dimension_semantics=("parallel", "parallel", "arbitrary"),
            vmem_limit_bytes=VMEM_LIMIT),
    )(x, emb)
    if Mp != M or Vp != V:
        out = out[:M, :V]
    return out


# --------------------------- elementwise kernels ---------------------------

def _ln_kernel(x_ref, g_ref, b_ref, o_ref):
    x = x_ref[...]
    mu = jnp.mean(x, axis=-1, keepdims=True)
    var = jnp.mean(jnp.square(x - mu), axis=-1, keepdims=True)
    o_ref[...] = ((x - mu) * jax.lax.rsqrt(var + 1e-5) * g_ref[...]
                  + b_ref[...]).astype(o_ref.dtype)


def pallas_layernorm(x, gamma, beta, *, tm=256):
    M, H = x.shape
    tm, Mp = _tile_for(M, tm)
    x = _pad_dim(x, 0, Mp)
    out = pl.pallas_call(
        _ln_kernel,
        out_shape=jax.ShapeDtypeStruct((Mp, H), x.dtype),
        grid=(Mp // tm,),
        in_specs=[
            pl.BlockSpec((tm, H), lambda i: (i, 0)),
            pl.BlockSpec((1, H), lambda i: (0, 0)),
            pl.BlockSpec((1, H), lambda i: (0, 0)),
        ],
        out_specs=pl.BlockSpec((tm, H), lambda i: (i, 0)),
        compiler_params=pltpu.CompilerParams(
            dimension_semantics=("parallel",),
            vmem_limit_bytes=VMEM_LIMIT),
    )(x, gamma, beta)
    if Mp != M:
        out = out[:M]
    return out


def _add_pos_kernel(e_ref, p_ref, o_ref):
    o_ref[...] = e_ref[...] + p_ref[...]


def pallas_add_pos(emb, pos, *, tt=256):
    # emb: (B, T, H); pos: (1, T, H) broadcast across B via the index_map.
    B, T, H = emb.shape
    tt = _seq_tile(T, tt)
    return pl.pallas_call(
        _add_pos_kernel,
        out_shape=jax.ShapeDtypeStruct((B, T, H), emb.dtype),
        grid=(B, T // tt),
        in_specs=[
            pl.BlockSpec((1, tt, H), lambda b, i: (b, i, 0)),
            pl.BlockSpec((1, tt, H), lambda b, i: (0, i, 0)),
        ],
        out_specs=pl.BlockSpec((1, tt, H), lambda b, i: (b, i, 0)),
        compiler_params=pltpu.CompilerParams(
            dimension_semantics=("parallel", "parallel"),
            vmem_limit_bytes=VMEM_LIMIT),
    )(emb, pos)


# --------------------------- flash attention ---------------------------

def _flash_attn_kernel(q_ref, k_ref, v_ref, o_ref, m_scr, l_scr, acc_scr, *,
                       n_heads, dh, scale, causal, tq, tk):
    qi = pl.program_id(1)
    ki = pl.program_id(2)

    @pl.when(ki == 0)
    def _():
        m_scr[...] = jnp.full(m_scr.shape, -jnp.inf, jnp.float32)
        l_scr[...] = jnp.zeros(l_scr.shape, jnp.float32)
        acc_scr[...] = jnp.zeros(acc_scr.shape, jnp.float32)

    def process_tile():
        q = q_ref[0] * scale                                # (tq, H); 1/sqrt(dh) folded
        k = k_ref[0]
        v = v_ref[0]
        if causal:
            rows = qi * tq + jax.lax.broadcasted_iota(jnp.int32, (tq, tk), 0)
            cols = ki * tk + jax.lax.broadcasted_iota(jnp.int32, (tq, tk), 1)
            neg = jnp.where(cols <= rows, 0.0, -1e30).astype(jnp.float32)
        for h in range(n_heads):                            # static unroll; 2-D MXU ops
            hs = slice(h * dh, (h + 1) * dh)
            qh = q[:, hs].astype(DOT_DTYPE)
            kh = k[:, hs].astype(DOT_DTYPE)
            vh = v[:, hs].astype(DOT_DTYPE)
            s = jax.lax.dot_general(qh, kh, (((1,), (1,)), ((), ())),
                                    preferred_element_type=jnp.float32)  # (tq, tk)
            if causal:
                s = s + neg
            m_prev = m_scr[h]                                             # (tq, 1)
            m_new = jnp.maximum(m_prev, jnp.max(s, axis=-1, keepdims=True))
            alpha = jnp.exp(m_prev - m_new)
            p = jnp.exp(s - m_new)
            l_scr[h] = alpha * l_scr[h] + jnp.sum(p, axis=-1, keepdims=True)
            acc_scr[h] = alpha * acc_scr[h] + jax.lax.dot_general(
                p.astype(DOT_DTYPE), vh, (((1,), (0,)), ((), ())),
                preferred_element_type=jnp.float32)                       # (tq, dh)
            m_scr[h] = m_new

    if causal:
        # skip kv tiles that lie entirely above the causal diagonal
        @pl.when(ki * tk <= qi * tq + (tq - 1))
        def _():
            process_tile()
    else:
        process_tile()

    @pl.when(ki == pl.num_programs(2) - 1)
    def _():
        outs = [acc_scr[h] * pl.reciprocal(l_scr[h], approx=False)
                for h in range(n_heads)]
        # heads re-packed along lanes -> (tq, H) lane-dense output block
        o_ref[0] = jnp.concatenate(outs, axis=-1).astype(o_ref.dtype)


def pallas_flash_attention(q_arr, k_arr, v_arr, q_col, k_col, v_col, *,
                           hidden, n_heads, causal, tq=256, tk=256):
    """q_arr/k_arr/v_arr are (B, T, W) activations where the Q/K/V columns occupy
    window [col*hidden : (col+1)*hidden]; heads are packed along lanes."""
    B, Tq = q_arr.shape[0], q_arr.shape[1]
    Tk = k_arr.shape[1]
    dh = hidden // n_heads
    tq = _seq_tile(Tq, tq)
    tk = _seq_tile(Tk, tk)
    kernel = functools.partial(_flash_attn_kernel, n_heads=n_heads, dh=dh,
                               scale=1.0 / math.sqrt(dh), causal=causal,
                               tq=tq, tk=tk)
    return pl.pallas_call(
        kernel,
        out_shape=jax.ShapeDtypeStruct((B, Tq, hidden), q_arr.dtype),
        grid=(B, Tq // tq, Tk // tk),
        in_specs=[
            pl.BlockSpec((1, tq, hidden), lambda b, qi, ki: (b, qi, q_col)),
            pl.BlockSpec((1, tk, hidden), lambda b, qi, ki: (b, ki, k_col)),
            pl.BlockSpec((1, tk, hidden), lambda b, qi, ki: (b, ki, v_col)),
        ],
        out_specs=pl.BlockSpec((1, tq, hidden), lambda b, qi, ki: (b, qi, 0)),
        scratch_shapes=[
            pltpu.VMEM((n_heads, tq, 1), jnp.float32),    # running max m
            pltpu.VMEM((n_heads, tq, 1), jnp.float32),    # running denom l
            pltpu.VMEM((n_heads, tq, dh), jnp.float32),   # running PV accumulator
        ],
        compiler_params=pltpu.CompilerParams(
            dimension_semantics=("parallel", "parallel", "arbitrary"),
            vmem_limit_bytes=VMEM_LIMIT),
    )(q_arr, k_arr, v_arr)


# ---------------------------- model composition ----------------------------

def self_attention(x2d, B, T, p, n_heads):
    # fused QKV projection: one (H, 3H) GEMM; attention reads its output directly
    # via BlockSpec column windows (no XLA transpose / split when H % 128 == 0).
    H = x2d.shape[1]
    qkv = pallas_linear(x2d, p["wqkv"], p["bqkv"])                      # (B*T, 3H)
    if H % 128 == 0:
        qkv3 = qkv.reshape(B, T, 3 * H)                                 # no-copy reshape
        attn = pallas_flash_attention(qkv3, qkv3, qkv3, 0, 1, 2,
                                      hidden=H, n_heads=n_heads, causal=True)
    else:
        # TODO(synk): lane-unaligned H -> fall back to an XLA column split.
        q3 = qkv[:, :H].reshape(B, T, H)
        k3 = qkv[:, H:2 * H].reshape(B, T, H)
        v3 = qkv[:, 2 * H:].reshape(B, T, H)
        attn = pallas_flash_attention(q3, k3, v3, 0, 0, 0,
                                      hidden=H, n_heads=n_heads, causal=True)
    return attn.reshape(B * T, H)


def cross_attention(x2d, memory, B, T, p, n_heads):
    H = x2d.shape[1]
    Tk = memory.shape[1]
    q = pallas_linear(x2d, p["wq"], p["bq"])                            # (B*T, H)
    kv = pallas_linear(memory.reshape(B * Tk, H), p["wkv"], p["bkv"])   # (B*Tk, 2H)
    q3 = q.reshape(B, T, H)
    if H % 128 == 0:
        kv3 = kv.reshape(B, Tk, 2 * H)
        attn = pallas_flash_attention(q3, kv3, kv3, 0, 0, 1,
                                      hidden=H, n_heads=n_heads, causal=False)
    else:
        k3 = kv[:, :H].reshape(B, Tk, H)
        v3 = kv[:, H:].reshape(B, Tk, H)
        attn = pallas_flash_attention(q3, k3, v3, 0, 0, 0,
                                      hidden=H, n_heads=n_heads, causal=False)
    return attn.reshape(B * T, H)


def decoder_layer(x2d, memory, B, T, p, n_heads):
    # post-norm (norm_first=False, PyTorch default); dropout = identity (eval).
    # wo projection and FFN carry the residual add + LayerNorm in their finalize.
    sa = self_attention(x2d, B, T, p["self_attn"], n_heads)
    x2d = pallas_linear_res_ln(sa, p["self_attn"]["wo"], p["self_attn"]["bo"],
                               x2d, p["ln1_g"], p["ln1_b"])
    ca = cross_attention(x2d, memory, B, T, p["cross_attn"], n_heads)
    x2d = pallas_linear_res_ln(ca, p["cross_attn"]["wo"], p["cross_attn"]["bo"],
                               x2d, p["ln2_g"], p["ln2_b"])
    x2d = pallas_ffn_res_ln(x2d, p["w1"], p["b1"], p["w2"], p["b2"],
                            p["ln3_g"], p["ln3_b"])
    return x2d


def transformer_decoder_forward(params, tgt_input, memory, temperature=1.0):
    B, T = tgt_input.shape
    H = params["embedding"].shape[1]
    n_heads = params["n_heads"]

    # embedding lookup (token-id gather) is XLA glue; everything after is Pallas
    emb = jnp.take(params["embedding"], tgt_input, axis=0)              # (B, T, H)
    x = pallas_add_pos(emb, params["pos_embedding"][:, :T])             # (B, T, H)
    # embed_dropout: identity in eval mode
    x2d = x.reshape(B * T, H)

    for lp in params["layers"]:
        x2d = decoder_layer(x2d, memory, B, T, lp, n_heads)

    xf = pallas_layernorm(x2d, params["out_ln_g"], params["out_ln_b"])
    # tied output projection (embedding weight, no transpose in HBM) + temperature
    logits = pallas_logits(xf, params["embedding"], 1.0 / temperature)
    return logits.reshape(B, T, -1)


# ------------------------- deterministic parameters -------------------------

def init_params(key, vocab, H, n_layers, n_heads, max_len):
    assert H % n_heads == 0
    ffn = 4 * H

    def dense(k, shape):
        return jax.random.normal(k, shape, jnp.float32) * 0.02

    keys = jax.random.split(key, 1 + n_layers)
    params = {
        "n_heads": n_heads,
        "embedding": dense(keys[0], (vocab, H)),
        "pos_embedding": jnp.zeros((1, max_len, H), jnp.float32),  # torch.zeros init
        "out_ln_g": jnp.ones((1, H), jnp.float32),
        "out_ln_b": jnp.zeros((1, H), jnp.float32),
        "layers": [],
    }
    for li in range(n_layers):
        ks = jax.random.split(keys[1 + li], 6)
        params["layers"].append({
            "self_attn": {
                "wqkv": dense(ks[0], (H, 3 * H)), "bqkv": jnp.zeros((1, 3 * H), jnp.float32),
                "wo": dense(ks[1], (H, H)), "bo": jnp.zeros((1, H), jnp.float32),
            },
            "cross_attn": {
                "wq": dense(ks[2], (H, H)), "bq": jnp.zeros((1, H), jnp.float32),
                "wkv": dense(ks[3], (H, 2 * H)), "bkv": jnp.zeros((1, 2 * H), jnp.float32),
                "wo": dense(ks[4], (H, H)), "bo": jnp.zeros((1, H), jnp.float32),
            },
            "w1": dense(ks[5], (H, ffn)), "b1": jnp.zeros((1, ffn), jnp.float32),
            "w2": dense(jax.random.fold_in(ks[5], 1), (ffn, H)),
            "b2": jnp.zeros((1, H), jnp.float32),
            "ln1_g": jnp.ones((1, H), jnp.float32), "ln1_b": jnp.zeros((1, H), jnp.float32),
            "ln2_g": jnp.ones((1, H), jnp.float32), "ln2_b": jnp.zeros((1, H), jnp.float32),
            "ln3_g": jnp.ones((1, H), jnp.float32), "ln3_b": jnp.zeros((1, H), jnp.float32),
        })
    return params


# ------------------------------ pure-JAX reference ------------------------------

def _ref_ln(x, g, b):
    mu = jnp.mean(x, -1, keepdims=True)
    var = jnp.mean(jnp.square(x - mu), -1, keepdims=True)
    return (x - mu) * jax.lax.rsqrt(var + 1e-5) * g[0] + b[0]


def _ref_mha(q_in, kv_in, wq, bq, wk, bk, wv, bv, wo, bo, nh, causal):
    B, Tq, H = q_in.shape
    Tk = kv_in.shape[1]
    dh = H // nh
    q = (q_in @ wq + bq[0]).reshape(B, Tq, nh, dh).transpose(0, 2, 1, 3)
    k = (kv_in @ wk + bk[0]).reshape(B, Tk, nh, dh).transpose(0, 2, 1, 3)
    v = (kv_in @ wv + bv[0]).reshape(B, Tk, nh, dh).transpose(0, 2, 1, 3)
    s = jnp.einsum("bhqd,bhkd->bhqk", q, k) / math.sqrt(dh)
    if causal:
        mask = jnp.triu(jnp.ones((Tq, Tk), jnp.bool_), 1)
        s = jnp.where(mask, jnp.float32(-1e30), s)
    a = jax.nn.softmax(s, axis=-1)
    o = jnp.einsum("bhqk,bhkd->bhqd", a, v).transpose(0, 2, 1, 3).reshape(B, Tq, H)
    return o @ wo + bo[0]


def ref_forward(params, tgt, memory, temperature=1.0):
    B, T = tgt.shape
    nh = params["n_heads"]
    x = jnp.take(params["embedding"], tgt, axis=0) + params["pos_embedding"][:, :T]
    for lp in params["layers"]:
        sp = lp["self_attn"]
        wq, wk, wv = jnp.split(sp["wqkv"], 3, axis=1)
        bq, bk, bv = jnp.split(sp["bqkv"], 3, axis=1)
        x = _ref_ln(x + _ref_mha(x, x, wq, bq, wk, bk, wv, bv,
                                 sp["wo"], sp["bo"], nh, True),
                    lp["ln1_g"], lp["ln1_b"])
        cp = lp["cross_attn"]
        wk2, wv2 = jnp.split(cp["wkv"], 2, axis=1)
        bk2, bv2 = jnp.split(cp["bkv"], 2, axis=1)
        x = _ref_ln(x + _ref_mha(x, memory, cp["wq"], cp["bq"], wk2, bk2, wv2, bv2,
                                 cp["wo"], cp["bo"], nh, False),
                    lp["ln2_g"], lp["ln2_b"])
        ff = jnp.maximum(x @ lp["w1"] + lp["b1"][0], 0.0) @ lp["w2"] + lp["b2"][0]
        x = _ref_ln(x + ff, lp["ln3_g"], lp["ln3_b"])
    x = _ref_ln(x, params["out_ln_g"], params["out_ln_b"])
    return (x @ params["embedding"].T) / temperature


# ----------------------------------- main -----------------------------------

if __name__ == "__main__":
    B, T_tgt, T_src = 2, 8, 16
    vocab, H, n_layers, n_heads, max_len = 256, 128, 2, 4, 32

    key = jax.random.PRNGKey(0)
    kp, kt, km = jax.random.split(key, 3)
    params = init_params(kp, vocab, H, n_layers, n_heads, max_len)
    tgt_input = jax.random.randint(kt, (B, T_tgt), 0, vocab)          # (B, T_tgt) ids
    memory = jax.random.normal(km, (B, T_src, H), jnp.float32)        # (B, T_src, H)

    logits = transformer_decoder_forward(params, tgt_input, memory, temperature=1.0)
    logits = jax.block_until_ready(logits)

    ref = ref_forward(params, tgt_input, memory, 1.0)
    assert logits.shape == (B, T_tgt, vocab)
    # bf16 MXU operands (f32 accumulation) -> tolerance loosened vs the pure-f32 ref
    err = float(jnp.max(jnp.abs(logits - ref)))
    assert jnp.allclose(logits, ref, atol=2e-2, rtol=2e-2), \
        f"mismatch vs pure-JAX reference (max abs err {err})"
    print("KERNEL_OK")
</pallas_src>

<mosaic_0001>
module attributes {stable_mosaic.version = 11 : i64} {
  func.func @_add_pos_kernel(%arg0: i32, %arg1: i32, %arg2: memref<1x8x128xf32, #tpu.memory_space<vmem>>, %arg3: memref<1x8x128xf32, #tpu.memory_space<vmem>>, %arg4: memref<1x8x128xf32, #tpu.memory_space<vmem>>) attributes {dimension_semantics = [#tpu.dimension_semantics<parallel>, #tpu.dimension_semantics<parallel>], iteration_bounds = array<i64: 2, 1>, scalar_prefetch = 0 : i64, scratch_operands = 0 : i64, tpu.core_type = #tpu.core_type<tc>, window_params = [{transform_indices = @transform_0, window_bounds = array<i64: 1, 8, 128>}, {transform_indices = @transform_1, window_bounds = array<i64: 1, 8, 128>}, {transform_indices = @transform_2, window_bounds = array<i64: 1, 8, 128>}]} {
    %c0 = arith.constant 0 : index
    %c0_0 = arith.constant 0 : index
    %c0_1 = arith.constant 0 : index
    %0 = vector.load %arg2[%c0, %c0_0, %c0_1] : memref<1x8x128xf32, #tpu.memory_space<vmem>>, vector<1x8x128xf32>
    %c0_2 = arith.constant 0 : index
    %c0_3 = arith.constant 0 : index
    %c0_4 = arith.constant 0 : index
    %1 = vector.load %arg3[%c0_2, %c0_3, %c0_4] : memref<1x8x128xf32, #tpu.memory_space<vmem>>, vector<1x8x128xf32>
    %2 = arith.addf %0, %1 : vector<1x8x128xf32>
    %c0_5 = arith.constant 0 : index
    %c0_6 = arith.constant 0 : index
    %c0_7 = arith.constant 0 : index
    %3 = vector.load %arg4[%c0_5, %c0_6, %c0_7] : memref<1x8x128xf32, #tpu.memory_space<vmem>>, vector<1x8x128xf32>
    tpu.vector_store %arg4[%c0_5, %c0_6, %c0_7], %2 {strides = array<i32>} : memref<1x8x128xf32, #tpu.memory_space<vmem>>, vector<1x8x128xf32>,
    return
  }
  func.func @transform_0(%arg0: i32, %arg1: i32) -> (i32, i32, i32) {
    %c0_i32 = arith.constant 0 : i32
    %c0_i32_0 = arith.constant 0 : i32
    return %arg0, %arg1, %c0_i32 : i32, i32, i32
  }
  func.func @transform_1(%arg0: i32, %arg1: i32) -> (i32, i32, i32) {
    %c0_i32 = arith.constant 0 : i32
    %c0_i32_0 = arith.constant 0 : i32
    %c0_i32_1 = arith.constant 0 : i32
    return %c0_i32, %arg1, %c0_i32_0 : i32, i32, i32
  }
  func.func @transform_2(%arg0: i32, %arg1: i32) -> (i32, i32, i32) {
    %c0_i32 = arith.constant 0 : i32
    %c0_i32_0 = arith.constant 0 : i32
    return %arg0, %arg1, %c0_i32 : i32, i32, i32
  }
}

</mosaic_0001>

<bundles_post_ra>
// kernel: tpu_custom_call.1
= control target key start
LH: loop header
LB: loop body
LE: loop exit
PB: predicated region body
PF: predicated region fallthrough
CT: control target
= control target key end

     0   :  { %7 = vsyncpa [#allocation3], 0  ;;  %s714_s0 = inlined_call_operand.hbm [shape: f32[2,8,128], index: 0, kind: input, shape index: {}]   ;;  %s715_s1 = inlined_call_operand.hbm [shape: f32[1,8,128], index: 1, kind: input, shape index: {}]   ;;  %s716_s2 = inlined_call_operand.hbm [shape: f32[2,8,128], index: 2, kind: output, shape index: {}]  }
   0x1   :  { %9 = vsyncpa [#allocation3 + $0x1], 0 }
   0x2   :  { %10 = vsyncpa [#allocation6], 0 }
   0x3   :  { %11 = vsyncpa [#allocation4], 0 }
   0x4   :  { %13 = vsyncpa [#allocation4 + $0x1], 0  ;;  %s553_s9 = smov 0   ;;  %s555_s10 = smov 0  }
   0x5   :  { %s557_s11 = smov 0   ;;  %s559_s12 = smov 0  }
   0x6   :  { %s561_s13 = smov 0   ;;  %s563_s14 = smov 0  }
   0x7 LB: > { %s307_s15 = sadd.s32 4294967295, %s533_s14   ;;  %s308_s16 = sadd.s32 4294967294, %s533_s14   ;;  %s533_s14 = sphi %s563_s14, %s19_s14   ;;  %s529_s13 = sphi %s561_s13, %s733_s13   ;;  %s525_s12 = sphi %s559_s12, %s732_s12   ;;  %s521_s11 = sphi %s557_s11, %s731_s11   ;;  %s517_s10 = sphi %s555_s10, %s730_s10   ;;  %s513_s9 = sphi %s553_s9, %s729_s9  }
   0x8   : > { %p53_p0 = scmp.ne.s32.totalorder %s517_s10, %s513_s9  ;;  %p587_p1 = scmp.eq.s32.totalorder %s307_s15, 0 }
   0x9   : > { %p591_p2 = scmp.eq.s32.totalorder %s307_s15, 1  ;;  %p111_p3 = scmp.eq.s32.totalorder %s308_s16, 1 }
   0xa   : > { %p597_p4 = por %p587_p1, %p53_p0  ;;  %p309_p5 = scmp.ge.s32.totalorder %s533_s14, 1 }
   0xb   : > { %p602_p6 = por %p111_p3, %p53_p0  ;;  %p118_p7 = scmp.lt.s32.totalorder %s533_s14, 3 }
   0xc   : > { %s720_s19 = scalar_select %p597_p4, 1, 0 }
   0xd   : > { %s721_s20 = scalar_select %p602_p6, 1, 0 }
   0xe   : > { %p607_p8 = pnand %p309_p5, %p118_p7  ;;  %s535_s22 = smov [#allocation5]  }
   0xf   : > { %s133_s23 = sshll.u32 %s535_s22, 4  ;;  %s31_s25 = sadd.s32 1, %s529_s13  ;;  %s134_s23 = int_to_ptr.vmem [resolvable:$true] %s133_s23 }
  0x10   : > { %p330_p10 = pneg %p607_p8  ;;  %s40_s26 = sadd.s32 1, %s521_s11 }
  0x11   : > { %p33_p12 = scmp.ge.s32.totalorder %s31_s25, 2  ;;  %s406_s27 = scalar_lea.vmem %s134_s23, 128 }
  0x12   : > { %p616_p11 = pnand %p330_p10, %p587_p1  ;;  %p407_p0 = scmp.ne.s32.totalorder %s134_s23, %s406_s27 }
  0x13   : > { %p414_p7 = scmp.lt.s32.totalorder %s134_s23, %s134_s23  ;;  %p415_p6 = scmp.lt.s32.totalorder %s406_s27, %s406_s27 }
  0x14   : > { %p397_p13 = pneg %p616_p11 }
  0x15   : > { %p416_p9 = por %p415_p6, %p414_p7 }
  0x16   : > { %p409_p3 = pnand %p407_p0, %p397_p13 }
  0x18   : > { %p410_p5 = pneg %p409_p3 }
  0x1a   : > { %p417_p4 = pnand %p416_p9, %p410_p5 }
  0x1c   : > { %420 = shalt.err (!%p417_p4)
}
  0x1d   : > { %333 = dma.hbm_to_vmem [thread:$0]  (!%p616_p11), %s715_s1, 128, %s134_s23, [#allocation6]  }
  0x1e   : > { %s735_s25 = smov (%p33_p12, %s31_s25), 0  ;;  %p47_p6 = scmp.ne.s32.totalorder %s521_s11, %s517_s10 }
  0x1f   : > { %p48_p4 = scmp.eq.s32.totalorder %s533_s14, 0  ;;  %s35_s30 = ssub.s32 %s529_s13, %s735_s25 }
  0x20   : > { %p343_p9 = scmp.lt.s32.totalorder %s533_s14, 2  ;;  %p38_p10 = scmp.eq.s32.totalorder %s35_s30, 0 }
  0x21   : > { %p49_p13 = por %p48_p4, %p47_p6  ;;  %p639_p0 = por %p591_p2, %p47_p6 }
  0x22   : > { %s144_s4 = sand.u32 1, %s521_s11   ;;  %s313_s7 = sshll.u32 %s529_s13, 7 }
  0x23   : > { %s645_s5 = scalar_select %p38_p10, %s521_s11, %s40_s26  }
  0x24   : > { %s312_s6 = sshll.u32 %s144_s4, 3  ;;  %s154_s16 = scalar_lea.hbm %s714_s0, %s313_s7 }
  0x25   : > { %s148_s22 = scalar_lea.vmem [#allocation2], %s312_s6  ;;  %p651_p11 = pnand %p343_p9, %p49_p13 }
  0x26   : > { %s156_s23 = sshll.u32 %s148_s22, 4  ;;  %s145_s18 = scalar_lea.sflag [#allocation3], %s144_s4  ;;  %s157_s23 = int_to_ptr.vmem [resolvable:$true] %s156_s23 }
  0x27   : > { %p423_p2 = pneg %p651_p11  ;;  %s434_s27 = scalar_lea.vmem %s157_s23, 128 }
  0x28   : > { %p435_p12 = scmp.ne.s32.totalorder %s157_s23, %s434_s27  ;;  %s536_s26 = smov [#allocation2]  }
  0x29   : > { %s439_s28 = sshll.u32 %s536_s26, 4  ;;  %s440_s28 = int_to_ptr.vmem [resolvable:$false] %s439_s28 }
  0x2a   : > { %p437_p3 = pnand %p435_p12, %p423_p2  ;;  %s441_s29 = scalar_lea.vmem %s440_s28, 256 }
  0x2b   : > { %p442_p7 = scmp.lt.s32.totalorder %s157_s23, %s440_s28  ;;  %p443_p6 = scmp.lt.s32.totalorder %s441_s29, %s434_s27 }
  0x2c   : > { %p438_p5 = pneg %p437_p3 }
  0x2d   : > { %p444_p4 = por %p443_p6, %p442_p7 }
  0x2f   : > { %p445_p10 = pnand %p444_p4, %p438_p5 }
  0x31   : > { %448 = shalt.err (!%p445_p10)
}
  0x32   : > { %337 = dma.hbm_to_vmem [thread:$0]  (!%p651_p11), %s154_s16, 128, %s157_s23, %s145_s18  }
  0x33   : > { %165 = sbr.rel (%p607_p8) target bundleno = 83 (0x53), region = 28  ;;  %s662_s30 = sand.u32 (!%p607_p8), 1, %s517_s10  }
  0x34   : > { %s315_s4 = sshll.u32 (!%p607_p8), %s662_s30, 3  ;;  %s168_s6 = scalar_lea.sflag (!%p607_p8), [#allocation3], %s662_s30 }
  0x35   : > { %s171_s7 = scalar_lea.vmem (!%p607_p8), [#allocation2], %s315_s4  ;;  %p726_p9 = scmp.ne.s32.totalorder (!%p607_p8), %s720_s19, 0 }
  0x38   : > { %500 = dma.done.wait (%p726_p9), %s168_s6, 128  }
  0x39   : > { %502 = vsyncadd (%p726_p9), %s168_s6, 4294967168 }
  0x3a   : > { %504 = dma.done.wait (%p587_p1), [#allocation6], 128  }
  0x3b   : > { %506 = vsyncadd (%p587_p1), [#allocation6], 4294967168  ;;  %s195_s21 = scalar_lea.vmem [#allocation7], %s315_s4  ;;  %s319_s15 = sshll.u32 %s525_s12, 7  ;;  %v196_v0 = vld [vmem:[%s171_s7] sm:$0xff]  ;;  %v197_v1 = vld [vmem:[#allocation5] sm:$0xff] }
  0x3c   : > { %s215_s8 = sshll.u32 %s195_s21, 4  ;;  %v198_v2 = vadd.f32 %v197_v1, %v196_v0  ;;  %s213_s19 = scalar_lea.hbm %s716_s2, %s319_s15  ;;  %s216_s8 = int_to_ptr.vmem [resolvable:$true] %s215_s8 }
  0x3d   : > { %s201_s23 = scalar_lea.sflag [#allocation4], %s662_s30  ;;  %s449_s24 = scalar_lea.vmem %s216_s8, 128 }
  0x3e   : > { %199 = vst [vmem:[%s195_s21] sm:$0xff] %v198_v2  ;;  %p450_p8 = scmp.ne.s32.totalorder %s216_s8, %s449_s24  ;;  %s537_s17 = smov [#allocation7]  }
  0x3f   : > { %s453_s18 = sshll.u32 %s537_s17, 4  ;;  %s454_s18 = int_to_ptr.vmem [resolvable:$false] %s453_s18 }
  0x40   : > { %p451_p1 = pnand %p450_p8, %p639_p0  ;;  %s455_s27 = scalar_lea.vmem %s454_s18, 256 }
  0x41   : > { %p456_p11 = scmp.lt.s32.totalorder %s216_s8, %s454_s18  ;;  %p457_p2 = scmp.lt.s32.totalorder %s455_s27, %s449_s24 }
  0x42   : > { %p452_p13 = pneg %p451_p1 }
  0x43   : > { %p458_p12 = por %p457_p2, %p456_p11 }
  0x45   : > { %p459_p3 = pnand %p458_p12, %p452_p13 }
  0x47   : > { %462 = shalt.err (!%p459_p3)
}
  0x48   : > { %s463_s12 = scalar_lea.hbm %s213_s19, 128  ;;  %s467_s29 = scalar_lea.hbm %s716_s2, 256 }
  0x49   : > { %p464_p5 = scmp.ne.s32.totalorder %s213_s19, %s463_s12  ;;  %p468_p4 = scmp.lt.s32.totalorder %s213_s19, %s716_s2 }
  0x4a   : > { %p469_p10 = scmp.lt.s32.totalorder %s467_s29, %s463_s12 }
  0x4b   : > { %p465_p7 = pnand %p464_p5, %p639_p0 }
  0x4c   : > { %p470_p9 = por %p469_p10, %p468_p4 }
  0x4d   : > { %p466_p6 = pneg %p465_p7 }
  0x4f   : > { %p471_p8 = pnand %p470_p9, %p466_p6 }
  0x51   : > { %474 = shalt.err (!%p471_p8)
}
  0x52   : > { %328 = dma.vmem_to_hbm [thread:$0]  (%p639_p0), %s216_s8, 128, %s213_s19, %s201_s23  }
  0x53 PF: > { %s227_s6 = sand.u32 1, %s513_s9   ;;  %p727_p1 = scmp.ne.s32.totalorder %s721_s20, 0 }
  0x54   : > { %p728_p13 = scmp.ge.s32.totalorder %s533_s14, 2  ;;  %s228_s7 = scalar_lea.sflag [#allocation4], %s227_s6 }
  0x56   : > { %p339_p11 = pnand %p728_p13, %p727_p1 }
  0x58   : > { %p340_p2 = pneg %p339_p11 }
  0x5a   : > { %508 = dma.done.wait (%p340_p2), %s228_s7, 128  }
  0x5b   : > { %510 = vsyncadd (%p340_p2), %s228_s7, 4294967168  ;;  %s19_s14 = sadd.s32 1, %s533_s14   ;;  %s729_s9 = smov %s517_s10 }
  0x5c   : > { %p16_p12 = scmp.ge.s32.totalorder %s19_s14, 4   ;;  %s730_s10 = smov %s521_s11 }
  0x5d   : > { %s731_s11 = smov %s645_s5  ;;  %s732_s12 = smov %s529_s13 }
  0x5e   : > { %s733_s13 = smov %s735_s25  ;;  %18 = sbr.rel (!%p16_p12) target bundleno = 7 (0x7), region = 78 }
  0x63   :  { %233 = vsyncpa [#allocation3], 1 }
  0x64   :  { %235 = vsyncpa [#allocation3 + $0x1], 1 }
  0x65   :  { %236 = vsyncpa [#allocation6], 1 }
  0x66   :  { %237 = vsyncpa [#allocation4], 1 }
  0x67   :  { %239 = vsyncpa [#allocation4 + $0x1], 1 }

</bundles_post_ra>
